<compile_context>
chip_gen: v7x
topology: tpu7x:2x2x1
jax: 0.10.0
libtpu: 0.0.40
codegen_flags: <defaults>
</compile_context>

<pallas_src>
import functools

import jax
import jax.numpy as jnp
from jax.experimental import pallas as pl
from jax.experimental.pallas import tpu as pltpu


def _round_up(a: int, m: int) -> int:
    return (a + m - 1) // m * m


def ensemble_kernel(x_ref, w_ref, bmean_ref, o_ref, acc_ref, *, inv_m: float):
    """One grid step == (one B tile, one C tile, one member model).

    x_ref     : (tb, Hp)     shared input tile (same block for every m, j)
    w_ref     : (1, Hp, tc)  current member's weight tile
    bmean_ref : (1, tc)      mean bias over members (added once, epilogue only)
    o_ref     : (tb, tc)     averaged logits tile (written on last m step)
    acc_ref   : (tb, tc) f32 running sum over members
    """
    m = pl.program_id(2)

    @pl.when(m == 0)
    def _():
        acc_ref[...] = jnp.zeros_like(acc_ref)

    acc_ref[...] += jnp.dot(
        x_ref[...], w_ref[0], preferred_element_type=jnp.float32
    )

    @pl.when(m == pl.num_programs(2) - 1)
    def _():
        o_ref[...] = (
            acc_ref[...] * inv_m + bmean_ref[...].astype(jnp.float32)
        ).astype(o_ref.dtype)


def ensemble_forward(x, w, b, *, tb=None, tc=None):
    """x: (B, H), w: (M, H, C), b: (M, C) -> (B, C) mean logits."""
    B, H = x.shape
    M, H2, C = w.shape
    assert H == H2 and b.shape == (M, C)

    # Lane-dense padding: last dims to multiples of 128, batch to sublane (8).
    H_pad = _round_up(H, 128)
    C_pad = _round_up(C, 128)
    B_pad = _round_up(B, 8)

    if tb is None:
        tb = min(B_pad, 128)
    if tc is None:
        tc = min(C_pad, 256)
    B_pad = _round_up(B_pad, tb)
    C_pad = _round_up(C_pad, tc)

    xp = jnp.pad(x, ((0, B_pad - B), (0, H_pad - H)))
    wp = jnp.pad(w, ((0, 0), (0, H_pad - H), (0, C_pad - C)))
    # mean_m(x @ W_m + b_m) == (sum_m x @ W_m) / M + mean_m(b_m):
    # fold the bias out of the per-member hot loop entirely.
    b_mean = jnp.mean(b.astype(jnp.float32), axis=0).astype(x.dtype)
    bp = jnp.pad(b_mean, (0, C_pad - C)).reshape(1, C_pad)

    grid = (B_pad // tb, C_pad // tc, M)

    out = pl.pallas_call(
        functools.partial(ensemble_kernel, inv_m=1.0 / M),
        out_shape=jax.ShapeDtypeStruct((B_pad, C_pad), x.dtype),
        grid_spec=pltpu.PrefetchScalarGridSpec(
            num_scalar_prefetch=0,
            grid=grid,
            in_specs=[
                pl.BlockSpec((tb, H_pad), lambda i, j, m: (i, 0)),       # x tile
                pl.BlockSpec((1, H_pad, tc), lambda i, j, m: (m, 0, j)),  # W_m tile
                pl.BlockSpec((1, tc), lambda i, j, m: (0, j)),            # mean bias
            ],
            out_specs=pl.BlockSpec((tb, tc), lambda i, j, m: (i, j)),
            scratch_shapes=[pltpu.VMEM((tb, tc), jnp.float32)],
        ),
        compiler_params=pltpu.CompilerParams(
            dimension_semantics=("parallel", "parallel", "arbitrary"),
        ),
    )(xp, wp, bp)
    return out[:B, :C]


def ensemble_ref(x, w, b):
    # Pure-JAX reference: mean over models of (x @ W_m + b_m)
    logits = jnp.einsum("bh,mhc->mbc", x, w) + b[:, None, :]
    return jnp.mean(logits, axis=0)


if __name__ == "__main__":
    key = jax.random.PRNGKey(0)
    B, H, C, M = 8, 32, 16, 3  # batch, hidden, classes, number of ensemble members

    kx, kw, kb = jax.random.split(key, 3)
    x = jax.random.normal(kx, (B, H), dtype=jnp.float32)
    # Deterministic "model" parameters (one Linear(H, C) per member).
    w = jax.random.normal(kw, (M, H, C), dtype=jnp.float32) * 0.1
    b = jax.random.normal(kb, (M, C), dtype=jnp.float32) * 0.1

    out = ensemble_forward(x, w, b)
    out = jax.block_until_ready(out)

    ref = ensemble_ref(x, w, b)
    assert out.shape == (B, C)
    assert jnp.allclose(out, ref, atol=1e-5, rtol=1e-5), "mismatch vs reference"

    print("KERNEL_OK")
</pallas_src>

<mosaic_0001>
module attributes {stable_mosaic.version = 11 : i64} {
  func.func @ensemble_kernel(%arg0: i32, %arg1: i32, %arg2: i32, %arg3: memref<8x128xf32, #tpu.memory_space<vmem>>, %arg4: memref<1x128x128xf32, #tpu.memory_space<vmem>>, %arg5: memref<1x128xf32, #tpu.memory_space<vmem>>, %arg6: memref<8x128xf32, #tpu.memory_space<vmem>>, %arg7: memref<8x128xf32, #tpu.memory_space<vmem>>) attributes {dimension_semantics = [#tpu.dimension_semantics<parallel>, #tpu.dimension_semantics<parallel>, #tpu.dimension_semantics<arbitrary>], iteration_bounds = array<i64: 1, 1, 3>, scalar_prefetch = 0 : i64, scratch_operands = 1 : i64, tpu.core_type = #tpu.core_type<tc>, window_params = [{transform_indices = @transform_0, window_bounds = array<i64: 8, 128>}, {transform_indices = @transform_1, window_bounds = array<i64: 1, 128, 128>}, {transform_indices = @transform_2, window_bounds = array<i64: 1, 128>}, {transform_indices = @transform_3, window_bounds = array<i64: 8, 128>}]} {
    %c0_i32 = arith.constant 0 : i32
    %0 = arith.cmpi eq, %arg2, %c0_i32 : i32
    %1 = arith.extui %0 : i1 to i32
    %c0_i32_0 = arith.constant 0 : i32
    %2 = arith.cmpi ne, %1, %c0_i32_0 : i32
    scf.if %2 {
      %cst_10 = arith.constant 0.000000e+00 : f32
      %13 = vector.broadcast %cst_10 : f32 to vector<8x128xf32>
      %c0_11 = arith.constant 0 : index
      %c0_12 = arith.constant 0 : index
      %14 = vector.load %arg7[%c0_11, %c0_12] : memref<8x128xf32, #tpu.memory_space<vmem>>, vector<8x128xf32>
      tpu.vector_store %arg7[%c0_11, %c0_12], %13 {strides = array<i32>} : memref<8x128xf32, #tpu.memory_space<vmem>>, vector<8x128xf32>,
    } else {
    }
    %c0 = arith.constant 0 : index
    %c0_1 = arith.constant 0 : index
    %3 = vector.load %arg7[%c0, %c0_1] : memref<8x128xf32, #tpu.memory_space<vmem>>, vector<8x128xf32>
    %c0_2 = arith.constant 0 : index
    %c0_3 = arith.constant 0 : index
    %4 = vector.load %arg3[%c0_2, %c0_3] : memref<8x128xf32, #tpu.memory_space<vmem>>, vector<8x128xf32>
    %c0_4 = arith.constant 0 : index
    %c0_5 = arith.constant 0 : index
    %c0_6 = arith.constant 0 : index
    %5 = vector.load %arg4[%c0_4, %c0_5, %c0_6] : memref<1x128x128xf32, #tpu.memory_space<vmem>>, vector<1x128x128xf32>
    %6 = vector.shape_cast %5 : vector<1x128x128xf32> to vector<128x128xf32>
    %cst = arith.constant dense<0.000000e+00> : vector<8x128xf32>
    %7 = tpu.matmul %4, %6, %cst {dimension_numbers = #tpu.dot_dimension_numbers<[1], [0], [0], [1], [0, 0, 1, 1], [], []>} : vector<8x128xf32>, vector<128x128xf32>, vector<8x128xf32> -> vector<8x128xf32>
    %8 = arith.addf %3, %7 : vector<8x128xf32>
    %c0_7 = arith.constant 0 : index
    %c0_8 = arith.constant 0 : index
    %9 = vector.load %arg7[%c0_7, %c0_8] : memref<8x128xf32, #tpu.memory_space<vmem>>, vector<8x128xf32>
    tpu.vector_store %arg7[%c0_7, %c0_8], %8 {strides = array<i32>} : memref<8x128xf32, #tpu.memory_space<vmem>>, vector<8x128xf32>,
    %c2_i32 = arith.constant 2 : i32
    %10 = arith.cmpi eq, %arg2, %c2_i32 : i32
    %11 = arith.extui %10 : i1 to i32
    %c0_i32_9 = arith.constant 0 : i32
    %12 = arith.cmpi ne, %11, %c0_i32_9 : i32
    scf.if %12 {
      %c0_10 = arith.constant 0 : index
      %c0_11 = arith.constant 0 : index
      %13 = vector.load %arg7[%c0_10, %c0_11] : memref<8x128xf32, #tpu.memory_space<vmem>>, vector<8x128xf32>
      %cst_12 = arith.constant 0.333333343 : f32
      %14 = vector.broadcast %cst_12 : f32 to vector<8x128xf32>
      %15 = arith.mulf %13, %14 : vector<8x128xf32>
      %c0_13 = arith.constant 0 : index
      %c0_14 = arith.constant 0 : index
      %16 = vector.load %arg5[%c0_13, %c0_14] : memref<1x128xf32, #tpu.memory_space<vmem>>, vector<1x128xf32>
      %17 = vector.broadcast %16 : vector<1x128xf32> to vector<8x128xf32>
      %18 = arith.addf %15, %17 : vector<8x128xf32>
      %c0_15 = arith.constant 0 : index
      %c0_16 = arith.constant 0 : index
      %19 = vector.load %arg6[%c0_15, %c0_16] : memref<8x128xf32, #tpu.memory_space<vmem>>, vector<8x128xf32>
      tpu.vector_store %arg6[%c0_15, %c0_16], %18 {strides = array<i32>} : memref<8x128xf32, #tpu.memory_space<vmem>>, vector<8x128xf32>,
    } else {
    }
    return
  }
  func.func @transform_0(%arg0: i32, %arg1: i32, %arg2: i32) -> (i32, i32) {
    %c0_i32 = arith.constant 0 : i32
    %c0_i32_0 = arith.constant 0 : i32
    return %arg0, %c0_i32 : i32, i32
  }
  func.func @transform_1(%arg0: i32, %arg1: i32, %arg2: i32) -> (i32, i32, i32) {
    %c0_i32 = arith.constant 0 : i32
    %c0_i32_0 = arith.constant 0 : i32
    return %arg2, %c0_i32, %arg1 : i32, i32, i32
  }
  func.func @transform_2(%arg0: i32, %arg1: i32, %arg2: i32) -> (i32, i32) {
    %c0_i32 = arith.constant 0 : i32
    %c0_i32_0 = arith.constant 0 : i32
    return %c0_i32, %arg1 : i32, i32
  }
  func.func @transform_3(%arg0: i32, %arg1: i32, %arg2: i32) -> (i32, i32) {
    %c0_i32 = arith.constant 0 : i32
    return %arg0, %arg1 : i32, i32
  }
}

</mosaic_0001>

<bundles_post_ra>
// kernel: tpu_custom_call.1
= control target key start
LH: loop header
LB: loop body
LE: loop exit
PB: predicated region body
PF: predicated region fallthrough
CT: control target
= control target key end

     0   :  { %8 = vsyncpa [#allocation4], 0  ;;  %s1018_s0 = inlined_call_operand.hbm [shape: f32[8,128], index: 0, kind: input, shape index: {}]   ;;  %s1019_s1 = inlined_call_operand.hbm [shape: f32[3,128,128], index: 1, kind: input, shape index: {}]   ;;  %s1020_s2 = inlined_call_operand.vmem [shape: f32[1,128], index: 2, kind: input, shape index: {}]   ;;  %s1021_s3 = inlined_call_operand.hbm [shape: f32[8,128], index: 3, kind: output, shape index: {}]  }
   0x1   :  { %9 = vsyncpa [#allocation7], 0 }
   0x2   :  { %11 = vsyncpa [#allocation7 + $0x1], 0 }
   0x3   :  { %12 = vsyncpa [#allocation5], 0  ;;  %s800_s12 = smov 0   ;;  %s802_s13 = smov 0  }
   0x4   :  { %s804_s14 = smov 0   ;;  %s806_s15 = smov 0  }
   0x5   :  { %s808_s16 = smov 0   ;;  %s810_s17 = smov 0  }
   0x6 LB: > { %s453_s18 = sadd.s32 4294967295, %s769_s17   ;;  %s72_s19 = sadd.s32 1, %s757_s14  ;;  %s769_s17 = sphi %s810_s17, %s18_s17   ;;  %s765_s16 = sphi %s808_s16, %s1042_s16   ;;  %s761_s15 = sphi %s806_s15, %s1041_s15   ;;  %s757_s14 = sphi %s804_s14, %s1040_s14   ;;  %s753_s13 = sphi %s802_s13, %s1039_s13   ;;  %s749_s12 = sphi %s800_s12, %s1038_s12  }
   0x7   : > { %p79_p0 = scmp.ne.s32.totalorder %s757_s14, %s753_s13  ;;  %p80_p1 = scmp.eq.s32.totalorder %s769_s17, 0 }
   0x8   : > { %p85_p2 = scmp.ne.s32.totalorder %s753_s13, %s749_s12  ;;  %p836_p3 = scmp.eq.s32.totalorder %s453_s18, 0 }
   0x9   : > { %p81_p4 = por %p80_p1, %p79_p0  ;;  %p454_p5 = scmp.ge.s32.totalorder %s769_s17, 1 }
   0xa   : > { %s1027_s20 = scalar_select %p836_p3, 1, 0 }
   0xb   : > { %p843_p6 = por %p836_p3, %p85_p2  ;;  %p150_p7 = scmp.lt.s32.totalorder %s769_s17, 4 }
   0xc   : > { %s771_s23 = smov [#allocation3]   ;;  %p567_p10 = scmp.lt.s32.totalorder %s769_s17, 3 }
   0xd   : > { %s1028_s21 = scalar_select %p843_p6, 1, 0 }
   0xe   : > { %p848_p8 = pnand %p454_p5, %p150_p7  ;;  %s165_s24 = sshll.u32 %s771_s23, 4  ;;  %s166_s24 = int_to_ptr.vmem [resolvable:$true] %s165_s24 }
   0xf   : > { %s182_s25 = sand.u32 1, %s757_s14   ;;  %p862_p12 = pnand %p567_p10, %p81_p4 }
  0x10   : > { %s1029_s22 = scalar_select %p848_p8, 1, 0 }
  0x11   : > { %p558_p9 = pneg %p848_p8  ;;  %s627_s30 = scalar_lea.hbm %s1018_s0, 128 }
  0x12   : > { %s1031_s27 = scalar_select %p862_p12, 1, 0 }
  0x13   : > { %p858_p11 = pnand %p558_p9, %p836_p3  ;;  %p628_p13 = scmp.ne.s32.totalorder %s1018_s0, %s627_s30 }
  0x14   : > { %p634_p5 = scmp.lt.u32.totalorder %s627_s30, %s1018_s0 }
  0x15   : > { %p629_p0 = pneg %p858_p11 }
  0x17   : > { %p630_p1 = pnand %p629_p0, %p628_p13 }
  0x19   : > { %p631_p2 = pneg %p630_p1 }
  0x1b   : > { %p636_p4 = pnand %p634_p5, %p631_p2 }
  0x1d   : > { %639 = shalt.err (!%p636_p4)
}
  0x1e   : > { %s640_s8 = scalar_lea.vmem %s166_s24, 128  ;;  %p648_p6 = scmp.lt.s32.totalorder %s166_s24, %s166_s24 }
  0x1f   : > { %p641_p7 = scmp.ne.s32.totalorder %s166_s24, %s640_s8  ;;  %p649_p3 = scmp.lt.s32.totalorder %s640_s8, %s640_s8 }
  0x21   : > { %p643_p9 = pnand %p641_p7, %p629_p0  ;;  %p650_p8 = por %p649_p3, %p648_p6 }
  0x23   : > { %p644_p10 = pneg %p643_p9 }
  0x25   : > { %p651_p12 = pnand %p650_p8, %p644_p10 }
  0x27   : > { %654 = shalt.err (!%p651_p12)
}
  0x28   : > { %561 = dma.hbm_to_vmem [thread:$0]  (!%p858_p11), %s1018_s0, 128, %s166_s24, [#allocation4]  }
  0x29   : > { %s30_s11 = sadd.s32 1, %s765_s16  ;;  %s458_s12 = sshll.u32 %s182_s25, 7 }
  0x2a   : > { %p31_p13 = scmp.ge.s32.totalorder %s30_s11, 3  ;;  %s471_s23 = sshll.u32 %s765_s16, 11 }
  0x2b   : > { %s186_s28 = scalar_lea.vmem [#allocation6], %s458_s12  ;;  %s891_s4 = scalar_lea.hbm %s1019_s1, %s471_s23 }
  0x2c   : > { %s194_s29 = sshll.u32 %s186_s28, 4  ;;  %s1044_s11 = smov (%p31_p13, %s30_s11), 0  ;;  %s893_s29 = int_to_ptr.vmem [resolvable:$true] %s194_s29 }
  0x2d   : > { %s67_s24 = ssub.s32 %s765_s16, %s1044_s11  ;;  %s903_s6 = scalar_lea.sflag [#allocation7], %s182_s25 }
  0x2e   : > { %p897_p3 = scmp.eq.s32.totalorder %s67_s24, 0  ;;  %s655_s7 = scalar_lea.hbm %s891_s4, 2048 }
  0x2f   : > { %p656_p6 = scmp.ne.s32.totalorder %s891_s4, %s655_s7  ;;  %p1033_p8 = scmp.ne.s32.totalorder %s1031_s27, 0 }
  0x30   : > { %s660_s10 = scalar_lea.hbm %s1019_s1, 6144  ;;  %p661_p1 = scmp.lt.u32.totalorder %s891_s4, %s1019_s1 }
  0x31   : > { %p657_p11 = pneg %p1033_p8  ;;  %p662_p2 = scmp.lt.u32.totalorder %s660_s10, %s655_s7 }
  0x32   : > { %p664_p4 = scmp.lt.u32.totalorder %s655_s7, %s891_s4 }
  0x33   : > { %p658_p12 = pnand %p657_p11, %p656_p6  ;;  %p663_p5 = por %p662_p2, %p661_p1 }
  0x35   : > { %p659_p0 = pneg %p658_p12  ;;  %p665_p7 = por %p664_p4, %p663_p5 }
  0x37   : > { %p666_p9 = pnand %p665_p7, %p659_p0 }
  0x39   : > { %669 = shalt.err (!%p666_p9)
}
  0x3a   : > { %s670_s25 = scalar_lea.vmem %s893_s29, 2048  ;;  %s772_s28 = smov [#allocation6]  }
  0x3b   : > { %p671_p10 = scmp.ne.s32.totalorder %s893_s29, %s670_s25  ;;  %s675_s26 = sshll.u32 %s772_s28, 4  ;;  %s676_s26 = int_to_ptr.vmem [resolvable:$false] %s675_s26 }
  0x3c   : > { %s677_s30 = scalar_lea.vmem %s676_s26, 4096  ;;  %p678_p12 = scmp.lt.s32.totalorder %s893_s29, %s676_s26 }
  0x3d   : > { %p673_p13 = pnand %p671_p10, %p657_p11  ;;  %p679_p1 = scmp.lt.s32.totalorder %s677_s30, %s670_s25 }
  0x3f   : > { %p674_p6 = pneg %p673_p13  ;;  %p680_p2 = por %p679_p1, %p678_p12 }
  0x41   : > { %p681_p5 = pnand %p680_p2, %p674_p6 }
  0x43   : > { %684 = shalt.err (!%p681_p5)
}
  0x44   : > { %s773_s24 = smov 128   ;;  %s774_s7 = smov 8  }
  0x45   : > { %565 = dma.hbm_to_vmem [thread:$0]  (!%p1033_p8), %s891_s4, 2048, %s893_s29, %s903_s6, %s773_s24, %s773_s24, %s774_s7  }
  0x46   : > { %s936_s8 = scalar_select %p897_p3, %s757_s14, %s72_s19  }
  0x47   : > { %p1034_p11 = scmp.ne.s32.totalorder %s1029_s22, 0 }
  0x48   : > { %p1035_p0 = scmp.ne.s32.totalorder (!%p1034_p11), %s1027_s20, 0 }
  0x49   : > { %206 = sbr.rel (%p1034_p11) target bundleno = 380 (0x17c), region = 32 }
  0x50   : > { %736 = dma.done.wait (%p1035_p0), [#allocation4], 128  }
  0x51   : > { %738 = vsyncadd (%p1035_p0), [#allocation4], 4294967168  ;;  %s212_s9 = sand.u32 1, %s753_s13   ;;  %p1036_p8 = scmp.ne.s32.totalorder %s1028_s21, 0 }
  0x52   : > { %s463_s10 = sshll.u32 %s212_s9, 7  ;;  %s213_s12 = scalar_lea.sflag [#allocation7], %s212_s9 }
  0x53   : > { %s945_s27 = scalar_lea.vmem [#allocation6], %s463_s10 }
  0x54   : > { %740 = dma.done.wait (%p1036_p8), %s213_s12, 2048  }
  0x55   : > { %742 = vsyncadd (%p1036_p8), %s213_s12, 4294965248  ;;  %p464_p3 = scmp.ne.s32.totalorder %s761_s15, 0 }
  0x56   : > { %v775_v0 = vmov (!%p464_p3), 0.0  }
  0x57   : > { %243 = sbr.rel (%p464_p3) target bundleno = 94 (0x5e), region = 44  ;;  %244 = vst [vmem:[#allocation2] sm:$0xff] (!%p464_p3), %v775_v0 }
  0x5e PF: > { %v247_v1 = vld [vmem:[%s945_s27] sm:$0xff]  ;;  %v248_v2 = vld [vmem:[%s945_s27 + $0x8] sm:$0xff]  ;;  %v249_v3 = vld [vmem:[%s945_s27 + $0x10] sm:$0xff]  ;;  %v776_v4 = vmov 0.0|0.0   ;;  %vm777_vm0 = vmmov 0   ;;  %v778_v7 = vmov 0.0  }
  0x5f   : > { %524 = vmatprep.subr.bf16.mxu0 %v776_v4  ;;  %v525_v5 = vpack.c.bf16 %v248_v2, %v247_v1  ;;  %v250_v6 = vld [vmem:[%s945_s27 + $0x18] sm:$0xff]  ;;  %521 = vmatprep.mubr.msk.f32.mxu0 %vm777_vm0, %v778_v7  ;;  %v251_v9 = vld [vmem:[%s945_s27 + $0x20] sm:$0xff]  ;;  %v252_v10 = vld [vmem:[%s945_s27 + $0x28] sm:$0xff]  ;;  %p465_p4 = scmp.ne.s32.totalorder %s761_s15, 2 }
  0x60   : > { %v528_v8 = vpack.c.bf16 %v250_v6, %v249_v3  ;;  %v531_v11 = vpack.c.bf16 %v252_v10, %v251_v9  ;;  %v253_v12 = vld [vmem:[%s945_s27 + $0x30] sm:$0xff]  ;;  %v254_v13 = vld [vmem:[%s945_s27 + $0x38] sm:$0xff]  ;;  %v255_v15 = vld [vmem:[%s945_s27 + $0x40] sm:$0xff] }
  0x61   : > { %526 = vmatpush3.bf16.msra.mxu0 %v525_v5  ;;  %v534_v14 = vpack.c.bf16 %v254_v13, %v253_v12  ;;  %v256_v16 = vld [vmem:[%s945_s27 + $0x48] sm:$0xff]  ;;  %v257_v18 = vld [vmem:[%s945_s27 + $0x50] sm:$0xff]  ;;  %v258_v19 = vld [vmem:[%s945_s27 + $0x58] sm:$0xff] }
  0x62   : > { %527 = vmatprep.subr.bf16.mxu0 %v776_v4  ;;  %v537_v17 = vpack.c.bf16 %v256_v16, %v255_v15  ;;  %v540_v20 = vpack.c.bf16 %v258_v19, %v257_v18  ;;  %v259_v21 = vld [vmem:[%s945_s27 + $0x60] sm:$0xff]  ;;  %v260_v22 = vld [vmem:[%s945_s27 + $0x68] sm:$0xff]  ;;  %v261_v24 = vld [vmem:[%s945_s27 + $0x70] sm:$0xff] }
  0x63   : > { %v543_v23 = vpack.c.bf16 %v260_v22, %v259_v21  ;;  %v262_v25 = vld [vmem:[%s945_s27 + $0x78] sm:$0xff]  ;;  %v245_v28 = vld [vmem:[#allocation2] sm:$0xff] }
  0x64   : > { %v546_v26 = vpack.c.bf16 %v262_v25, %v261_v24  ;;  %v246_v27 = vld [vmem:[#allocation3] sm:$0xff]  ;;  %v466_v33 = vld [vmem:[%s1020_s2] ss:$0 sm:$0xff] (!%p465_p4) }
  0x65   : > { %529 = vmatpush3.bf16.msra.mxu0 %v528_v8 }
  0x66   : > { %530 = vmatprep.subr.bf16.mxu0 %v776_v4 }
  0x69   : > { %532 = vmatpush3.bf16.msra.mxu0 %v531_v11 }
  0x6a   : > { %533 = vmatprep.subr.bf16.mxu0 %v776_v4 }
  0x6d   : > { %535 = vmatpush3.bf16.msra.mxu0 %v534_v14 }
  0x6e   : > { %536 = vmatprep.subr.bf16.mxu0 %v776_v4 }
  0x71   : > { %538 = vmatpush3.bf16.msra.mxu0 %v537_v17 }
  0x72   : > { %539 = vmatprep.subr.bf16.mxu0 %v776_v4 }
  0x75   : > { %541 = vmatpush3.bf16.msra.mxu0 %v540_v20 }
  0x76   : > { %542 = vmatprep.subr.bf16.mxu0 %v776_v4 }
  0x79   : > { %544 = vmatpush3.bf16.msra.mxu0 %v543_v23 }
  0x7a   : > { %545 = vmatprep.subr.bf16.mxu0 %v776_v4 }
  0x7d   : > { %547 = vmatpush3.bf16.msra.mxu0 %v546_v26 }
  0x80   : > { %522 = vmatmul.mubr.f32.vlgmr.msra.gmra.mrb[0].mxu0 %v246_v27 }
 0x150   : > { %338 = sbr.rel (%p465_p4) target bundleno = 355 (0x163), region = 48 }
 0x153   : > { %v329_v29 = vpop.f32.mrb[0].mxu0 }
 0x154   : > { %v333_v30 = vadd.f32 %v329_v29, %v245_v28  ;;  %v523_v31 = vpop.f32.mrb[1].mxu0 }
 0x156   : > { %334 = vst [vmem:[#allocation2] sm:$0xff] %v333_v30 }
 0x15d   : > { %v339_v32 = vld [vmem:[#allocation2] sm:$0xff] }
 0x15e   : > { %v340_v34 = vmul.f32 0.33333334, %v339_v32 }
 0x160   : > { %v348_v35 = vadd.f32 %v466_v33, %v340_v34 }
 0x162   : > { %349 = vst [vmem:[#allocation8] sm:$0xff] %v348_v35 }
 0x163 PF: > { %p974_p7 = scmp.eq.s32.totalorder %s453_s18, 2  ;;  %s779_s22 = smov [#allocation8]  }
 0x164   : > { %s360_s29 = sshll.u32 %s779_s22, 4  ;;  %s361_s29 = int_to_ptr.vmem [resolvable:$true] %s360_s29 }
 0x165   : > { %s685_s15 = scalar_lea.vmem %s361_s29, 128  ;;  %p692_p6 = scmp.lt.s32.totalorder %s361_s29, %s361_s29 }
 0x166   : > { %p686_p9 = scmp.ne.s32.totalorder %s361_s29, %s685_s15  ;;  %p693_p12 = scmp.lt.s32.totalorder %s685_s15, %s685_s15 }
 0x168   : > { %p687_p10 = pnand %p686_p9, %p974_p7  ;;  %p694_p1 = por %p693_p12, %p692_p6 }
 0x16a   : > { %p688_p13 = pneg %p687_p10 }
 0x16c   : > { %p695_p2 = pnand %p694_p1, %p688_p13 }
 0x16e   : > { %698 = shalt.err (!%p695_p2)
}
 0x16f   : > { %s699_s18 = scalar_lea.hbm %s1021_s3, 128 }
 0x170   : > { %p700_p5 = scmp.ne.s32.totalorder %s1021_s3, %s699_s18  ;;  %p705_p8 = scmp.lt.u32.totalorder %s699_s18, %s1021_s3 }
 0x172   : > { %p701_p11 = pnand %p700_p5, %p974_p7 }
 0x174   : > { %p702_p0 = pneg %p701_p11 }
 0x176   : > { %p707_p3 = pnand %p705_p8, %p702_p0 }
 0x178   : > { %710 = shalt.err (!%p707_p3)
}
 0x179   : > { %555 = dma.vmem_to_hbm [thread:$0]  (%p974_p7), %s361_s29, 128, %s1021_s3, [#allocation5]  }
 0x17a   : > { %744 = dma.done.wait (%p974_p7), [#allocation5], 128  }
 0x17b   : > { %746 = vsyncadd (%p974_p7), [#allocation5], 4294967168 }
 0x17c PF: > { %s18_s17 = sadd.s32 1, %s769_s17   ;;  %s1038_s12 = smov %s753_s13 }
 0x17d   : > { %p15_p4 = scmp.ge.s32.totalorder %s18_s17, 5   ;;  %s1039_s13 = smov %s757_s14 }
 0x17e   : > { %s1040_s14 = smov %s936_s8  ;;  %s1041_s15 = smov %s765_s16 }
 0x17f   : > { %s1042_s16 = smov %s1044_s11  ;;  %17 = sbr.rel (!%p15_p4) target bundleno = 6 (0x6), region = 87 }
 0x186   :  { %373 = vsyncpa [#allocation4], 1 }
 0x187   :  { %375 = vsyncpa [#allocation4 + $0x1], 1 }
 0x188   :  { %376 = vsyncpa [#allocation7], 1 }
 0x189   :  { %378 = vsyncpa [#allocation7 + $0x1], 1 }
 0x18a   :  { %379 = vsyncpa [#allocation5], 1 }
 0x18b   :  { %381 = vsyncpa [#allocation5 + $0x1], 1 }

</bundles_post_ra>
